<compile_context>
chip_gen: v5e
topology: v5e:2x2
jax: 0.10.0
libtpu: 0.0.40
codegen_flags: <defaults>
</compile_context>

<pallas_src>
import functools

import jax
import jax.numpy as jnp
from jax import lax
from jax.experimental import pallas as pl
from jax.experimental.pallas import tpu as pltpu

_LANE = 128
_SUBLANE = 8


def _round_up(v, m):
    return (v + m - 1) // m * m


# ---------------------------------------------------------------------------
# generation-aware VMEM sizing
# ---------------------------------------------------------------------------
def _vmem_config():
    """Returns (per_block_budget_bytes, vmem_limit_bytes, fused_cap_bytes).

    Sized so ~4 block-sized buffers (pipeline double-buffering + scratch) stay
    well under the scoped-VMEM limit of the generation.  v7x has 64 MiB VMEM
    per TensorCore (vs 128 MiB on v5e/v6e), so unknown chips get the
    conservative (v7x-safe) sizing.
    """
    kind = ""
    try:
        kind = jax.devices()[0].device_kind.lower()
    except Exception:
        pass
    big_vmem = ("v5" in kind) or ("v6" in kind)
    if big_vmem:
        return 6 * 1024 * 1024, 64 * 1024 * 1024, 40 * 1024 * 1024
    return 3 * 1024 * 1024, 40 * 1024 * 1024, 20 * 1024 * 1024


# ---------------------------------------------------------------------------
# tiling helper for the 2-D (rows = N*C, T) layout
# ---------------------------------------------------------------------------
def _choose_tiles(rows, t, block_budget):
    """Pick (row_blk, t_blk, rows_pad, t_pad) for an f32 (rows, t) layout.

    t_blk: a 128-multiple divisor of t_pad (lane-dense, unmasked vst), or the
    full T when T <= 128 (full dims are always legal block shapes).
    row_blk: a multiple of 8 dividing rows_pad (or full rows when rows <= 8),
    grown so a block stays under block_budget bytes.
    """
    # --- time (lane) axis ---
    if t <= _LANE:
        t_blk, t_pad = t, t
    else:
        t_pad = _round_up(t, _LANE)
        k = t_pad // _LANE
        t_blk = _LANE
        for d in range(1, k + 1):
            if k % d == 0:
                width = d * _LANE
                if width * _SUBLANE * 4 <= block_budget:
                    t_blk = max(t_blk, width)
    # --- row (sublane) axis ---
    if rows <= _SUBLANE:
        row_blk, rows_pad = rows, rows
    else:
        rows_pad = _round_up(rows, _SUBLANE)
        max_rows = max(_SUBLANE, (block_budget // (4 * t_blk)) // _SUBLANE * _SUBLANE)
        row_blk = _SUBLANE
        r = _SUBLANE
        lim = min(rows_pad, max_rows)
        while r <= lim:
            if rows_pad % r == 0:
                row_blk = r
            r += _SUBLANE
    return row_blk, t_blk, rows_pad, t_pad


def _pad_2d(x2, rows_pad, t_pad):
    rows, t = x2.shape
    if rows_pad == rows and t_pad == t:
        return x2
    return jnp.pad(x2, ((0, rows_pad - rows), (0, t_pad - t)))


# ---------------------------------------------------------------------------
# pass 1: per-row sum / sum-of-squares (row axis parallel, time axis reduced)
# ---------------------------------------------------------------------------
def _stats_kernel(x_ref, sum_ref, sumsq_ref, acc1_ref, acc2_ref):
    jt = pl.program_id(1)

    @pl.when(jt == 0)
    def _init():
        acc1_ref[...] = jnp.zeros_like(acc1_ref)
        acc2_ref[...] = jnp.zeros_like(acc2_ref)

    x = x_ref[...].astype(jnp.float32)
    acc1_ref[...] += x                      # VPU adds only in the hot loop
    acc2_ref[...] += x * x                  # square in-kernel: no extra HBM pass

    @pl.when(jt == pl.num_programs(1) - 1)
    def _finalize():                        # one lane reduce per row block
        sum_ref[...] = jnp.sum(acc1_ref[...], axis=1, keepdims=True)
        sumsq_ref[...] = jnp.sum(acc2_ref[...], axis=1, keepdims=True)


def _stats_pallas(x2, row_blk, t_blk, vmem_limit):
    rows_pad, t_pad = x2.shape
    grid = (rows_pad // row_blk, t_pad // t_blk)
    return pl.pallas_call(
        _stats_kernel,
        out_shape=(
            jax.ShapeDtypeStruct((rows_pad, 1), jnp.float32),
            jax.ShapeDtypeStruct((rows_pad, 1), jnp.float32),
        ),
        grid_spec=pltpu.PrefetchScalarGridSpec(
            num_scalar_prefetch=0,
            grid=grid,
            in_specs=[pl.BlockSpec((row_blk, t_blk), lambda i, j: (i, j))],
            out_specs=[
                pl.BlockSpec((row_blk, 1), lambda i, j: (i, 0)),
                pl.BlockSpec((row_blk, 1), lambda i, j: (i, 0)),
            ],
            scratch_shapes=[
                pltpu.VMEM((row_blk, t_blk), jnp.float32),
                pltpu.VMEM((row_blk, t_blk), jnp.float32),
            ],
        ),
        compiler_params=pltpu.CompilerParams(
            # row axis parallel (disjoint output blocks -> no cross-core race),
            # time axis is the resident reduction.
            dimension_semantics=("parallel", "arbitrary"),
            vmem_limit_bytes=vmem_limit),
    )(x2)


# ---------------------------------------------------------------------------
# pass 2: fused normalize   out = x * scale_row + shift_row
# ---------------------------------------------------------------------------
def _normalize_kernel(x_ref, scale_ref, shift_ref, o_ref):
    o_ref[...] = (x_ref[...] * scale_ref[...] + shift_ref[...]).astype(o_ref.dtype)


def _normalize_pallas(x2, scale_row, shift_row, row_blk, t_blk, vmem_limit, out_dtype):
    rows_pad, t_pad = x2.shape
    grid = (rows_pad // row_blk, t_pad // t_blk)
    return pl.pallas_call(
        _normalize_kernel,
        out_shape=jax.ShapeDtypeStruct((rows_pad, t_pad), out_dtype),
        grid_spec=pltpu.PrefetchScalarGridSpec(
            num_scalar_prefetch=0,
            grid=grid,
            in_specs=[
                pl.BlockSpec((row_blk, t_blk), lambda i, j: (i, j)),
                pl.BlockSpec((row_blk, 1), lambda i, j: (i, 0)),
                pl.BlockSpec((row_blk, 1), lambda i, j: (i, 0)),
            ],
            out_specs=pl.BlockSpec((row_blk, t_blk), lambda i, j: (i, j)),
        ),
        compiler_params=pltpu.CompilerParams(
            dimension_semantics=("parallel", "parallel"),
            vmem_limit_bytes=vmem_limit),
    )(x2, scale_row, shift_row)


# ---------------------------------------------------------------------------
# fused single-pass fast path: whole x resident in VMEM
# ---------------------------------------------------------------------------
def _fused_kernel(x_ref, gamma_ref, beta_ref, ref_mean_ref, ref_meansq_ref,
                  out_ref, mean_ref, meansq_ref, *, eps, inv_count, new_coeff):
    x = x_ref[...].astype(jnp.float32)                             # (N, C, T)
    mean = jnp.sum(jnp.sum(x, axis=2, keepdims=True),
                   axis=0, keepdims=True) * inv_count              # (1, C, 1)
    mean_sq = jnp.sum(jnp.sum(x * x, axis=2, keepdims=True),
                      axis=0, keepdims=True) * inv_count
    old_coeff = 1.0 - new_coeff                                    # 0.0 for first pass
    mean = new_coeff * mean + old_coeff * ref_mean_ref[...]
    mean_sq = new_coeff * mean_sq + old_coeff * ref_meansq_ref[...]
    inv_std = lax.rsqrt(eps + mean_sq - mean * mean)               # EUP
    scale = gamma_ref[...] * inv_std
    shift = beta_ref[...] - mean * scale
    out_ref[...] = (x * scale + shift).astype(out_ref.dtype)
    mean_ref[...] = mean
    meansq_ref[...] = mean_sq


def _fused_pallas(x, gamma, beta, ref_mean, ref_mean_sq, *, eps, new_coeff, vmem_limit):
    n, c, t = x.shape
    kernel = functools.partial(
        _fused_kernel, eps=float(eps), inv_count=1.0 / float(n * t),
        new_coeff=float(new_coeff))
    return pl.pallas_call(
        kernel,
        out_shape=(
            jax.ShapeDtypeStruct((n, c, t), x.dtype),
            jax.ShapeDtypeStruct((1, c, 1), jnp.float32),
            jax.ShapeDtypeStruct((1, c, 1), jnp.float32),
        ),
        compiler_params=pltpu.CompilerParams(vmem_limit_bytes=vmem_limit),
    )(x, gamma.astype(jnp.float32), beta.astype(jnp.float32),
      ref_mean, ref_mean_sq)


# ---------------------------------------------------------------------------
# module-level forward
# ---------------------------------------------------------------------------
def virtual_batch_norm_1d(x, gamma, beta, *, eps=1e-5, ref_mean=None,
                          ref_mean_sq=None, use_fused=None):
    """Pallas implementation of VirtualBatchNorm1d.forward.

    x:     (N, C, T);  gamma/beta: (1, C, 1)
    ref_mean / ref_mean_sq: optional (1, C, 1) reference-batch statistics.
    Returns (out, mean, mean_sq) with mean/mean_sq shaped (1, C, 1) float32.
    """
    assert x.ndim == 3, "expected (N, C, T) input"
    n, c, t = x.shape
    assert gamma.shape[1] == c and beta.shape[1] == c, "feature-size mismatch"

    block_budget, vmem_limit, fused_cap = _vmem_config()
    has_ref = ref_mean is not None and ref_mean_sq is not None
    new_coeff = 1.0 / (n + 1.0) if has_ref else 1.0

    # ---- fused fast path: whole (layout-padded) x resident in VMEM ----
    padded_bytes = n * _round_up(c, _SUBLANE) * _round_up(max(t, 1), _LANE) * 4
    if use_fused is None:
        use_fused = 4 * padded_bytes <= fused_cap
    if use_fused:
        rm = (ref_mean if has_ref else jnp.zeros((1, c, 1), jnp.float32))
        rs = (ref_mean_sq if has_ref else jnp.zeros((1, c, 1), jnp.float32))
        out, mean, mean_sq = _fused_pallas(
            x, gamma, beta, rm.astype(jnp.float32), rs.astype(jnp.float32),
            eps=eps, new_coeff=new_coeff, vmem_limit=vmem_limit)
        return out, mean, mean_sq

    # ---- two-pass tiled path (large inputs) ----
    rows = n * c
    x2 = x.reshape(rows, t)                       # free view for contiguous x
    row_blk, t_blk, rows_pad, t_pad = _choose_tiles(rows, t, block_budget)
    x2p = _pad_2d(x2, rows_pad, t_pad)            # zero pad only when needed

    row_sums, row_sumsqs = _stats_pallas(x2p, row_blk, t_blk, vmem_limit)

    # O(N*C) glue: per-row partials -> per-channel stats.
    count = float(n * t)
    sum_c = row_sums[:rows, 0].reshape(n, c).sum(axis=0)
    sumsq_c = row_sumsqs[:rows, 0].reshape(n, c).sum(axis=0)
    mean_c = sum_c / count
    mean_sq_c = sumsq_c / count

    if has_ref:
        old_coeff = 1.0 - new_coeff
        mean_c = new_coeff * mean_c + old_coeff * ref_mean.reshape(c).astype(jnp.float32)
        mean_sq_c = new_coeff * mean_sq_c + old_coeff * ref_mean_sq.reshape(c).astype(jnp.float32)

    # O(C) glue: fold (x - mean)/std*gamma + beta into x*scale + shift.
    inv_std = lax.rsqrt(eps + mean_sq_c - mean_c * mean_c)
    scale_c = gamma.reshape(c).astype(jnp.float32) * inv_std
    shift_c = beta.reshape(c).astype(jnp.float32) - mean_c * scale_c
    scale_row = jnp.pad(jnp.tile(scale_c, n), (0, rows_pad - rows)).reshape(rows_pad, 1)
    shift_row = jnp.pad(jnp.tile(shift_c, n), (0, rows_pad - rows)).reshape(rows_pad, 1)

    out_pad = _normalize_pallas(x2p, scale_row, shift_row, row_blk, t_blk,
                                vmem_limit, x.dtype)
    out = out_pad[:rows, :t].reshape(n, c, t)
    return out, mean_c.reshape(1, c, 1), mean_sq_c.reshape(1, c, 1)


# ---------------------------------------------------------------------------
# plain-JAX reference mirroring the PyTorch forward
# ---------------------------------------------------------------------------
def _reference(x, gamma, beta, *, eps=1e-5, ref_mean=None, ref_mean_sq=None):
    mean = jnp.mean(x, axis=2, keepdims=True).mean(axis=0, keepdims=True)
    mean_sq = jnp.mean(x ** 2, axis=2, keepdims=True).mean(axis=0, keepdims=True)
    if ref_mean is not None and ref_mean_sq is not None:
        n = x.shape[0]
        new_coeff = 1.0 / (n + 1.0)
        old_coeff = 1.0 - new_coeff
        mean = new_coeff * mean + old_coeff * ref_mean
        mean_sq = new_coeff * mean_sq + old_coeff * ref_mean_sq
    std = jnp.sqrt(eps + mean_sq - mean ** 2)
    out = (x - mean) / std * gamma + beta
    return out, mean, mean_sq


if __name__ == "__main__":
    # Small shapes consistent with the module: VirtualBatchNorm1d(num_features=4)
    N, C, T = 2, 4, 16
    EPS = 1e-5

    key = jax.random.PRNGKey(0)
    k_ref, k_x, k_g = jax.random.split(key, 3)

    x_refbatch = jax.random.normal(k_ref, (N, C, T), dtype=jnp.float32)
    x_batch = jax.random.normal(k_x, (N, C, T), dtype=jnp.float32)
    # gamma ~ Normal(ones - 0.1, 0.02), beta = zeros  (module's Parameter init)
    gamma = (jnp.ones((1, C, 1), jnp.float32) - 0.1
             + 0.02 * jax.random.normal(k_g, (1, C, 1), dtype=jnp.float32))
    beta = jnp.zeros((1, C, 1), jnp.float32)

    for fused in (True, False):   # exercise both the fused and the tiled path
        # --- reference-batch pass (forward_first: ref stats are None) ---
        out1, m1, ms1 = virtual_batch_norm_1d(
            x_refbatch, gamma, beta, eps=EPS, use_fused=fused)
        out1 = jax.block_until_ready(out1)
        r_out1, r_m1, r_ms1 = _reference(x_refbatch, gamma, beta, eps=EPS)
        assert jnp.allclose(out1, r_out1, atol=1e-5, rtol=1e-5), "ref-pass output mismatch"
        assert jnp.allclose(m1, r_m1, atol=1e-6, rtol=1e-5), "ref-pass mean mismatch"
        assert jnp.allclose(ms1, r_ms1, atol=1e-6, rtol=1e-5), "ref-pass mean_sq mismatch"

        # --- training-batch pass (forward_head: blend with reference stats) ---
        out2, m2, ms2 = virtual_batch_norm_1d(
            x_batch, gamma, beta, eps=EPS, ref_mean=m1, ref_mean_sq=ms1,
            use_fused=fused)
        out2 = jax.block_until_ready(out2)
        r_out2, r_m2, r_ms2 = _reference(
            x_batch, gamma, beta, eps=EPS, ref_mean=r_m1, ref_mean_sq=r_ms1)
        assert jnp.allclose(out2, r_out2, atol=1e-5, rtol=1e-5), "head-pass output mismatch"
        assert jnp.allclose(m2, r_m2, atol=1e-6, rtol=1e-5), "head-pass mean mismatch"
        assert jnp.allclose(ms2, r_ms2, atol=1e-6, rtol=1e-5), "head-pass mean_sq mismatch"

    # TODO(synk): PyTorch-side .detach()/clone autograd semantics and the runtime
    # shape-assert helper (_normalize_runtime_control) have no kernel equivalent
    # (forward-only here).
    print("KERNEL_OK")
</pallas_src>

<mosaic_0001>
module attributes {stable_mosaic.version = 11 : i64} {
  func.func @_fused_kernel(%arg0: memref<2x4x16xf32, #tpu.memory_space<vmem>>, %arg1: memref<1x4x1xf32, #tpu.memory_space<vmem>>, %arg2: memref<1x4x1xf32, #tpu.memory_space<vmem>>, %arg3: memref<1x4x1xf32, #tpu.memory_space<vmem>>, %arg4: memref<1x4x1xf32, #tpu.memory_space<vmem>>, %arg5: memref<2x4x16xf32, #tpu.memory_space<vmem>>, %arg6: memref<1x4x1xf32, #tpu.memory_space<vmem>>, %arg7: memref<1x4x1xf32, #tpu.memory_space<vmem>>) attributes {dimension_semantics = [], scalar_prefetch = 0 : i64, scratch_operands = 0 : i64, tpu.core_type = #tpu.core_type<tc>} {
    %c0 = arith.constant 0 : index
    %c0_0 = arith.constant 0 : index
    %c0_1 = arith.constant 0 : index
    %0 = vector.load %arg0[%c0, %c0_0, %c0_1] : memref<2x4x16xf32, #tpu.memory_space<vmem>>, vector<2x4x16xf32>
    %cst = arith.constant dense<0.000000e+00> : vector<2x4xf32>
    %1 = vector.multi_reduction <add>, %0, %cst [2] : vector<2x4x16xf32> to vector<2x4xf32>
    %2 = vector.shape_cast %1 : vector<2x4xf32> to vector<2x4x1xf32>
    %cst_2 = arith.constant dense<0.000000e+00> : vector<4x1xf32>
    %3 = vector.multi_reduction <add>, %2, %cst_2 [0] : vector<2x4x1xf32> to vector<4x1xf32>
    %4 = vector.shape_cast %3 : vector<4x1xf32> to vector<1x4x1xf32>
    %cst_3 = arith.constant 3.125000e-02 : f32
    %5 = vector.broadcast %cst_3 : f32 to vector<1x4x1xf32>
    %6 = arith.mulf %4, %5 : vector<1x4x1xf32>
    %7 = arith.mulf %0, %0 : vector<2x4x16xf32>
    %cst_4 = arith.constant dense<0.000000e+00> : vector<2x4xf32>
    %8 = vector.multi_reduction <add>, %7, %cst_4 [2] : vector<2x4x16xf32> to vector<2x4xf32>
    %9 = vector.shape_cast %8 : vector<2x4xf32> to vector<2x4x1xf32>
    %cst_5 = arith.constant dense<0.000000e+00> : vector<4x1xf32>
    %10 = vector.multi_reduction <add>, %9, %cst_5 [0] : vector<2x4x1xf32> to vector<4x1xf32>
    %11 = vector.shape_cast %10 : vector<4x1xf32> to vector<1x4x1xf32>
    %cst_6 = arith.constant 3.125000e-02 : f32
    %12 = vector.broadcast %cst_6 : f32 to vector<1x4x1xf32>
    %13 = arith.mulf %11, %12 : vector<1x4x1xf32>
    %cst_7 = arith.constant 1.000000e+00 : f32
    %14 = vector.broadcast %cst_7 : f32 to vector<1x4x1xf32>
    %15 = arith.mulf %14, %6 : vector<1x4x1xf32>
    %c0_8 = arith.constant 0 : index
    %c0_9 = arith.constant 0 : index
    %c0_10 = arith.constant 0 : index
    %16 = vector.load %arg3[%c0_8, %c0_9, %c0_10] : memref<1x4x1xf32, #tpu.memory_space<vmem>>, vector<1x4x1xf32>
    %cst_11 = arith.constant 0.000000e+00 : f32
    %17 = vector.broadcast %cst_11 : f32 to vector<1x4x1xf32>
    %18 = arith.mulf %17, %16 : vector<1x4x1xf32>
    %19 = arith.addf %15, %18 : vector<1x4x1xf32>
    %cst_12 = arith.constant 1.000000e+00 : f32
    %20 = vector.broadcast %cst_12 : f32 to vector<1x4x1xf32>
    %21 = arith.mulf %20, %13 : vector<1x4x1xf32>
    %c0_13 = arith.constant 0 : index
    %c0_14 = arith.constant 0 : index
    %c0_15 = arith.constant 0 : index
    %22 = vector.load %arg4[%c0_13, %c0_14, %c0_15] : memref<1x4x1xf32, #tpu.memory_space<vmem>>, vector<1x4x1xf32>
    %cst_16 = arith.constant 0.000000e+00 : f32
    %23 = vector.broadcast %cst_16 : f32 to vector<1x4x1xf32>
    %24 = arith.mulf %23, %22 : vector<1x4x1xf32>
    %25 = arith.addf %21, %24 : vector<1x4x1xf32>
    %cst_17 = arith.constant 9.99999974E-6 : f32
    %26 = vector.broadcast %cst_17 : f32 to vector<1x4x1xf32>
    %27 = arith.addf %26, %25 : vector<1x4x1xf32>
    %28 = arith.mulf %19, %19 : vector<1x4x1xf32>
    %29 = arith.subf %27, %28 : vector<1x4x1xf32>
    %30 = math.rsqrt %29 : vector<1x4x1xf32>
    %c0_18 = arith.constant 0 : index
    %c0_19 = arith.constant 0 : index
    %c0_20 = arith.constant 0 : index
    %31 = vector.load %arg1[%c0_18, %c0_19, %c0_20] : memref<1x4x1xf32, #tpu.memory_space<vmem>>, vector<1x4x1xf32>
    %32 = arith.mulf %31, %30 : vector<1x4x1xf32>
    %c0_21 = arith.constant 0 : index
    %c0_22 = arith.constant 0 : index
    %c0_23 = arith.constant 0 : index
    %33 = vector.load %arg2[%c0_21, %c0_22, %c0_23] : memref<1x4x1xf32, #tpu.memory_space<vmem>>, vector<1x4x1xf32>
    %34 = arith.mulf %19, %32 : vector<1x4x1xf32>
    %35 = arith.subf %33, %34 : vector<1x4x1xf32>
    %36 = vector.broadcast %32 : vector<1x4x1xf32> to vector<2x4x16xf32>
    %37 = arith.mulf %0, %36 : vector<2x4x16xf32>
    %38 = vector.broadcast %35 : vector<1x4x1xf32> to vector<2x4x16xf32>
    %39 = arith.addf %37, %38 : vector<2x4x16xf32>
    %c0_24 = arith.constant 0 : index
    %c0_25 = arith.constant 0 : index
    %c0_26 = arith.constant 0 : index
    %40 = vector.load %arg5[%c0_24, %c0_25, %c0_26] : memref<2x4x16xf32, #tpu.memory_space<vmem>>, vector<2x4x16xf32>
    tpu.vector_store %arg5[%c0_24, %c0_25, %c0_26], %39 {strides = array<i32>} : memref<2x4x16xf32, #tpu.memory_space<vmem>>, vector<2x4x16xf32>,
    %c0_27 = arith.constant 0 : index
    %c0_28 = arith.constant 0 : index
    %c0_29 = arith.constant 0 : index
    %41 = vector.load %arg6[%c0_27, %c0_28, %c0_29] : memref<1x4x1xf32, #tpu.memory_space<vmem>>, vector<1x4x1xf32>
    tpu.vector_store %arg6[%c0_27, %c0_28, %c0_29], %19 {strides = array<i32>} : memref<1x4x1xf32, #tpu.memory_space<vmem>>, vector<1x4x1xf32>,
    %c0_30 = arith.constant 0 : index
    %c0_31 = arith.constant 0 : index
    %c0_32 = arith.constant 0 : index
    %42 = vector.load %arg7[%c0_30, %c0_31, %c0_32] : memref<1x4x1xf32, #tpu.memory_space<vmem>>, vector<1x4x1xf32>
    tpu.vector_store %arg7[%c0_30, %c0_31, %c0_32], %25 {strides = array<i32>} : memref<1x4x1xf32, #tpu.memory_space<vmem>>, vector<1x4x1xf32>,
    return
  }
}

</mosaic_0001>

<bundles_post_ra>
// kernel: tpu_custom_call.1
= control target key start
LH: loop header
LB: loop body
LE: loop exit
PB: predicated region body
PF: predicated region fallthrough
CT: control target
= control target key end

     0   :  { %vm26_vm0 = vcmask 125952   ;;  %s236_s0 = inlined_call_operand.vmem [shape: f32[2,4,16], index: 0, kind: input, shape index: {}]   ;;  %s237_s1 = inlined_call_operand.vmem [shape: f32[1,4,1], index: 1, kind: input, shape index: {}]   ;;  %s238_s2 = inlined_call_operand.vmem [shape: f32[1,4,1], index: 2, kind: input, shape index: {}]   ;;  %s239_s3 = inlined_call_operand.vmem [shape: f32[1,4,1], index: 3, kind: input, shape index: {}]   ;;  %s240_s4 = inlined_call_operand.vmem [shape: f32[1,4,1], index: 4, kind: input, shape index: {}]   ;;  %s241_s5 = inlined_call_operand.hbm [shape: f32[2,4,16], index: 5, kind: output, shape index: {0}]   ;;  %s242_s6 = inlined_call_operand.vmem [shape: f32[1,4,1], index: 6, kind: output, shape index: {1}]   ;;  %s243_s7 = inlined_call_operand.vmem [shape: f32[1,4,1], index: 7, kind: output, shape index: {2}]  }
   0x1   :  { %v200_v0 = vld [vmem:[%s236_s0] sm:$0xf] }
   0x2   :  { %v27_v1 = vsel %vm26_vm0, %v200_v0, 0.0  ;;  %v38_v2 = vmul.f32 %v200_v0, %v200_v0 }
   0x3   :  { %13 = vsyncpa [#allocation3], 0  ;;  %28 = vadd.xlane.f32.xlu0 %v27_v1  ;;  %v25_v3 = vld [vmem:[%s236_s0 + $0x4] sm:$0xf]  ;;  %v153_v8 = vmov 0   ;;  %vm33_vm1 = vcmask 1043456  }
   0x4   :  { %v40_v4 = vsel %vm26_vm0, %v38_v2, 0.0  ;;  %v39_v5 = vmul.f32 %v25_v3, %v25_v3  ;;  %v30_v6 = vsel %vm26_vm0, %v25_v3, 0.0  ;;  %123 = vset.pattern.permute.xlu2 %v153_v8  ;;  %124 = vset.pattern.permute.xlu0 %v153_v8  ;;  %v50_v11 = vld [vmem:[%s239_s3] sm:$0xf]  ;;  %vm90_vm2 = vcmask 3072   ;;  %s154_s12 = smov [#allocation2]  }
   0x5   :  { %41 = vadd.xlane.f32.xlu1 %v40_v4  ;;  %v53_v15 = vld [vmem:[%s240_s4] sm:$0xf]  ;;  %v51_v16 = vmul.f32 0.0, %v50_v11  ;;  %s97_s13 = sshll.u32 %s154_s12, 4  ;;  %s99_s16 = sshll.u32 %s241_s5, 4  ;;  %s98_s13 = int_to_ptr.vmem [resolvable:$true] %s97_s13  ;;  %s100_s16 = int_to_ptr.hbm [resolvable:$true] %s99_s16 }
   0x6   :  { %v43_v7 = vsel %vm26_vm0, %v39_v5, 0.0  ;;  %v54_v22 = vmul.f32 0.0, %v53_v15  ;;  %v69_v36 = vld [vmem:[%s237_s1] sm:$0xf]  ;;  %s155_s1 = smov 64  }
   0x7   :  { %v71_v40 = vld [vmem:[%s238_s2] sm:$0xf]  ;;  %s156_s2 = smov 4  }
   0xb   :  { %31 = vadd.xlane.f32.xlu0 %v30_v6 }
   0xd   :  { %44 = vadd.xlane.f32.xlu1 %v43_v7 }
  0x76   :  { %v29_v9 = vpop.xlane.xlu0 %28 }
  0x77   :  { %v34_v13 = vsel %vm33_vm1, %v29_v9, 0.0 }
  0x78   :  { %v42_v10 = vpop.xlane.xlu1 %41 }
  0x79   :  { %v46_v19 = vsel %vm33_vm1, %v42_v10, 0.0 }
  0x7e   :  { %v32_v12 = vpop.xlane.xlu0 %31 }
  0x7f   :  { %v35_v14 = vsel %vm33_vm1, %v32_v12, 0.0 }
  0x80   :  { %v36_v17 = vadd.f32 %v35_v14, %v34_v13  ;;  %v45_v18 = vpop.xlane.xlu1 %44 }
  0x81   :  { %v47_v20 = vsel %vm33_vm1, %v45_v18, 0.0 }
  0x82   :  { %v37_v21 = vmul.f32 0.03125, %v36_v17  ;;  %v48_v23 = vadd.f32 %v47_v20, %v46_v19 }
  0x84   :  { %v52_v24 = vadd.f32 %v51_v16, %v37_v21  ;;  %v49_v25 = vmul.f32 0.03125, %v48_v23 }
  0x86   :  { %v55_v26 = vadd.f32 %v54_v22, %v49_v25  ;;  %91 = vst.msk [vmem:[%s242_s6] sm:$0xf] %vm90_vm2, %v52_v24  ;;  %v57_v27 = vmul.f32 %v52_v24, %v52_v24 }
  0x88   :  { %v56_v28 = vadd.f32 1e-05, %v55_v26  ;;  %92 = vst.msk [vmem:[%s243_s7] sm:$0xf] %vm90_vm2, %v55_v26 }
  0x8a   :  { %v58_v29 = vsub.f32 %v56_v28, %v57_v27 }
  0x8c   :  { %125 = vrsqrt.f32 %v58_v29  ;;  %vm65_vm4 = vweird.f32 %v58_v29 }
  0x92   :  { %v126_v30 = vpop.eup %125 }
  0x93   :  { %v60_v31 = vmul.f32 %v126_v30, %v58_v29  ;;  %vm66_vm3 = vweird.f32 %v126_v30 }
  0x94   :  { %vm67_vm5 = vmor %vm65_vm4, %vm66_vm3 }
  0x95   :  { %v61_v32 = vmul.f32 %v126_v30, %v60_v31 }
  0x97   :  { %v62_v33 = vmul.f32 0.5, %v61_v32 }
  0x99   :  { %v63_v34 = vsub.f32 1.5, %v62_v33 }
  0x9b   :  { %v64_v35 = vmul.f32 %v126_v30, %v63_v34 }
  0x9d   :  { %v68_v37 = vsel %vm67_vm5, %v126_v30, %v64_v35 }
  0x9e   :  { %v70_v38 = vmul.f32 %v69_v36, %v68_v37 }
  0xa0   :  { %76 = vperm.xlu2 %123, %v70_v38   ;;  %v72_v39 = vmul.f32 %v70_v38, %v52_v24 }
  0xa2   :  { %v73_v41 = vsub.f32 %v71_v40, %v72_v39 }
  0xa8   :  { %83 = vperm.xlu2 %123, %v73_v41  }
  0xfa   :  { %v77_v42 = vpop.permute.xlu2 %76 }
  0xfb   :  { %v79_v43 = vmul.f32 %v77_v42, %v200_v0  ;;  %v80_v44 = vmul.f32 %v77_v42, %v25_v3 }
 0x102   :  { %v84_v45 = vpop.permute.xlu2 %83 }
 0x103   :  { %v86_v46 = vadd.f32 %v84_v45, %v79_v43  ;;  %v87_v47 = vadd.f32 %v84_v45, %v80_v44 }
 0x105   :  { %88 = vst.msk [vmem:[#allocation2] sm:$0xf] %vm26_vm0, %v86_v46 }
 0x106   :  { %89 = vst.msk [vmem:[#allocation2 + $0x4] sm:$0xf] %vm26_vm0, %v87_v47 }
 0x107   :  { %105 = dma.vmem_to_hbm [thread:$0]  %s98_s13, 128, %s100_s16, [#allocation3], %s155_s1, %s155_s1, %s156_s2  }
 0x108   :  { %151 = dma.done.wait [#allocation3], 128  }
 0x109   :  { %152 = vsyncadd [#allocation3], 4294967168 }
 0x10a   :  { %118 = vsyncpa [#allocation3], 1 }

</bundles_post_ra>
